<compile_context>
chip_gen: v7x
topology: tpu7x:2x2x1
jax: 0.10.0
libtpu: 0.0.40
codegen_flags: <defaults>
</compile_context>

<pallas_src>
import functools

import jax
import jax.numpy as jnp
from jax.experimental import pallas as pl
from jax.experimental.pallas import tpu as pltpu


def _mm(x_f32, w_ref):
    """bf16 MXU matmul with f32 accumulation. Weights are already bf16 in VMEM."""
    return jnp.dot(
        x_f32.astype(jnp.bfloat16), w_ref[...],
        preferred_element_type=jnp.float32,
    )


def vae2_kernel(
    # batch-blocked inputs
    x_ref, eps_ref,
    # encoder params (resident)
    ew0_ref, eb0_ref, ew1_ref, eb1_ref,
    # fused mu|logvar head (resident)
    wml_ref, bml_ref,
    # decoder params (resident)
    dw0_ref, db0_ref, dw1_ref, db1_ref, dw2_ref, db2_ref,
    # batch-blocked outputs
    recon_ref, mulv_ref,
):
    x = x_ref[...]            # (TM, input_dim) f32

    # ---- encoder: (Linear + ReLU) x2 ----
    h = jnp.maximum(_mm(x, ew0_ref) + eb0_ref[...], 0.0)
    h = jnp.maximum(_mm(h, ew1_ref) + eb1_ref[...], 0.0)

    # ---- fused latent heads: one matmul producing [mu | logvar] ----
    mulv = _mm(h, wml_ref) + bml_ref[...]          # (TM, 2*latent) f32
    latent = mulv.shape[-1] // 2
    mu = mulv[:, :latent]
    logvar = mulv[:, latent:]

    # ---- reparameterize: z = mu + eps * exp(0.5 * logvar) (all f32) ----
    z = mu + eps_ref[...] * jnp.exp(0.5 * logvar)

    # ---- decoder: (Linear + ReLU) x2, final Linear (no ReLU) ----
    d = jnp.maximum(_mm(z, dw0_ref) + db0_ref[...], 0.0)
    d = jnp.maximum(_mm(d, dw1_ref) + db1_ref[...], 0.0)
    recon = _mm(d, dw2_ref) + db2_ref[...]

    recon_ref[...] = recon.astype(recon_ref.dtype)
    mulv_ref[...] = mulv.astype(mulv_ref.dtype)


def _pick_tm(batch):
    """Largest batch tile: full batch if small, else a multiple of 8 (<=512)."""
    if batch <= 512:
        return batch if (batch < 8 or batch % 8 == 0) else batch  # full-dim block is always legal
    return 512


@functools.partial(jax.jit, static_argnames=())
def _identity(x):
    return x


def vae2_forward(x, eps, params):
    """x: [B, input_dim] f32, eps: [B, latent_dim] f32, params: dict of f32 arrays.

    Returns (recon, mu, logvar), all f32.
    """
    B, input_dim = x.shape
    latent_dim = params["wmu"].shape[1]
    hidden_dim = params["ew0"].shape[1]

    # ---- parameter prep (one-time): bf16 weights, fused mu|logvar head ----
    bf16 = jnp.bfloat16
    ew0 = params["ew0"].astype(bf16)
    ew1 = params["ew1"].astype(bf16)
    wml = jnp.concatenate([params["wmu"], params["wsg"]], axis=1).astype(bf16)
    bml = jnp.concatenate([params["bmu"], params["bsg"]], axis=1)  # f32
    dw0 = params["dw0"].astype(bf16)
    dw1 = params["dw1"].astype(bf16)
    dw2 = params["dw2"].astype(bf16)
    eb0, eb1 = params["eb0"], params["eb1"]
    db0, db1, db2 = params["db0"], params["db1"], params["db2"]

    # ---- batch tiling ----
    tm = _pick_tm(B)
    grid = (pl.cdiv(B, tm),)

    blocked = lambda feat: pl.BlockSpec((tm, feat), lambda i: (i, 0))
    resident = lambda shape: pl.BlockSpec(shape, lambda i: (0, 0))

    in_specs = [
        blocked(input_dim),                     # x
        blocked(latent_dim),                    # eps
        resident(ew0.shape), resident(eb0.shape),
        resident(ew1.shape), resident(eb1.shape),
        resident(wml.shape), resident(bml.shape),
        resident(dw0.shape), resident(db0.shape),
        resident(dw1.shape), resident(db1.shape),
        resident(dw2.shape), resident(db2.shape),
    ]
    out_specs = (
        blocked(input_dim),                     # recon
        blocked(2 * latent_dim),                # [mu | logvar] (lane-denser)
    )
    out_shapes = (
        jax.ShapeDtypeStruct((B, input_dim), jnp.float32),
        jax.ShapeDtypeStruct((B, 2 * latent_dim), jnp.float32),
    )

    # advisory cost estimate for XLA scheduling
    mm_flops = 2 * B * (
        input_dim * hidden_dim + hidden_dim * hidden_dim          # encoder
        + hidden_dim * 2 * latent_dim                              # fused heads
        + latent_dim * hidden_dim + hidden_dim * hidden_dim        # decoder
        + hidden_dim * input_dim
    )
    param_bytes = sum(
        a.size * a.dtype.itemsize
        for a in (ew0, eb0, ew1, eb1, wml, bml, dw0, db0, dw1, db1, dw2, db2)
    )
    io_bytes = (x.size + eps.size) * 4 + (B * input_dim + B * 2 * latent_dim) * 4
    cost = pl.CostEstimate(
        flops=mm_flops,
        transcendentals=B * latent_dim,
        bytes_accessed=param_bytes + io_bytes,
    )

    recon, mulv = pl.pallas_call(
        vae2_kernel,
        out_shape=out_shapes,
        grid=grid,
        in_specs=in_specs,
        out_specs=out_specs,
        compiler_params=pltpu.CompilerParams(
            dimension_semantics=("parallel",),   # megacore-shard batch on v7x
        ),
        cost_estimate=cost,
    )(
        x, eps,
        ew0, eb0, ew1, eb1,
        wml, bml,
        dw0, db0, dw1, db1, dw2, db2,
    )

    mu = mulv[:, :latent_dim]
    logvar = mulv[:, latent_dim:]
    return recon, mu, logvar


def init_params(key, input_dim, hidden_dim, latent_dim):
    """Deterministic synthetic init. Weight shape: (in, out); bias shape: (1, out)."""
    def lin(k, i, o):
        kw, kb = jax.random.split(k)
        bound = 1.0 / jnp.sqrt(i)
        w = jax.random.uniform(kw, (i, o), jnp.float32, -bound, bound)
        b = jax.random.uniform(kb, (1, o), jnp.float32, -bound, bound)
        return w, b

    keys = jax.random.split(key, 7)
    ew0, eb0 = lin(keys[0], input_dim, hidden_dim)
    ew1, eb1 = lin(keys[1], hidden_dim, hidden_dim)
    wmu, bmu = lin(keys[2], hidden_dim, latent_dim)
    wsg, bsg = lin(keys[3], hidden_dim, latent_dim)
    dw0, db0 = lin(keys[4], latent_dim, hidden_dim)
    dw1, db1 = lin(keys[5], hidden_dim, hidden_dim)
    dw2, db2 = lin(keys[6], hidden_dim, input_dim)
    return dict(
        ew0=ew0, eb0=eb0, ew1=ew1, eb1=eb1,
        wmu=wmu, bmu=bmu, wsg=wsg, bsg=bsg,
        dw0=dw0, db0=db0, dw1=dw1, db1=db1, dw2=dw2, db2=db2,
    )


def vae2_reference(x, eps, p):
    """Pure-JAX reference mirroring the kernel's bf16-matmul / f32-accumulate math."""
    bf16 = jnp.bfloat16

    def mm(a, w):
        return jnp.dot(a.astype(bf16), w.astype(bf16),
                       preferred_element_type=jnp.float32)

    h = jnp.maximum(mm(x, p["ew0"]) + p["eb0"], 0.0)
    h = jnp.maximum(mm(h, p["ew1"]) + p["eb1"], 0.0)
    mu = mm(h, p["wmu"]) + p["bmu"]
    logvar = mm(h, p["wsg"]) + p["bsg"]
    z = mu + eps * jnp.exp(0.5 * logvar)
    d = jnp.maximum(mm(z, p["dw0"]) + p["db0"], 0.0)
    d = jnp.maximum(mm(d, p["dw1"]) + p["db1"], 0.0)
    recon = mm(d, p["dw2"]) + p["db2"]
    return recon, mu, logvar


if __name__ == "__main__":
    # Small shapes consistent with the module (num_hidden=2). B is a multiple
    # of the batch tile so the grid has several steps (exercises pipelining +
    # resident weights).
    B, INPUT_DIM, HIDDEN_DIM, LATENT_DIM = 32, 16, 32, 8

    key = jax.random.PRNGKey(0)
    kx, keps, kparams = jax.random.split(key, 3)

    x = jax.random.normal(kx, (B, INPUT_DIM), jnp.float32)
    # eps corresponds to torch.randn_like(std) in reparameterize; generated
    # deterministically here and fed into the kernel.
    # TODO(synk): could be generated in-kernel via pltpu.prng_seed/prng_random_bits.
    eps = jax.random.normal(keps, (B, LATENT_DIM), jnp.float32)
    params = init_params(kparams, INPUT_DIM, HIDDEN_DIM, LATENT_DIM)

    recon, mu, logvar = vae2_forward(x, eps, params)
    jax.block_until_ready((recon, mu, logvar))

    # correctness vs pure-JAX reference (same bf16-matmul numerics)
    r_ref, m_ref, lv_ref = vae2_reference(x, eps, params)
    assert jnp.allclose(recon, r_ref, atol=2e-3, rtol=2e-3), \
        float(jnp.max(jnp.abs(recon - r_ref)))
    assert jnp.allclose(mu, m_ref, atol=2e-3, rtol=2e-3), \
        float(jnp.max(jnp.abs(mu - m_ref)))
    assert jnp.allclose(logvar, lv_ref, atol=2e-3, rtol=2e-3), \
        float(jnp.max(jnp.abs(logvar - lv_ref)))

    print("KERNEL_OK")
</pallas_src>

<mosaic_0001>
module attributes {stable_mosaic.version = 11 : i64} {
  func.func @vae2_kernel(%arg0: i32, %arg1: memref<32x16xf32, #tpu.memory_space<vmem>>, %arg2: memref<32x8xf32, #tpu.memory_space<vmem>>, %arg3: memref<16x32xbf16, #tpu.memory_space<vmem>>, %arg4: memref<1x32xf32, #tpu.memory_space<vmem>>, %arg5: memref<32x32xbf16, #tpu.memory_space<vmem>>, %arg6: memref<1x32xf32, #tpu.memory_space<vmem>>, %arg7: memref<32x16xbf16, #tpu.memory_space<vmem>>, %arg8: memref<1x16xf32, #tpu.memory_space<vmem>>, %arg9: memref<8x32xbf16, #tpu.memory_space<vmem>>, %arg10: memref<1x32xf32, #tpu.memory_space<vmem>>, %arg11: memref<32x32xbf16, #tpu.memory_space<vmem>>, %arg12: memref<1x32xf32, #tpu.memory_space<vmem>>, %arg13: memref<32x16xbf16, #tpu.memory_space<vmem>>, %arg14: memref<1x16xf32, #tpu.memory_space<vmem>>, %arg15: memref<32x16xf32, #tpu.memory_space<vmem>>, %arg16: memref<32x16xf32, #tpu.memory_space<vmem>>) attributes {dimension_semantics = [#tpu.dimension_semantics<parallel>], iteration_bounds = array<i64: 1>, scalar_prefetch = 0 : i64, scratch_operands = 0 : i64, tpu.core_type = #tpu.core_type<tc>, window_params = [{transform_indices = @transform_0, window_bounds = array<i64: 32, 16>}, {transform_indices = @transform_1, window_bounds = array<i64: 32, 8>}, {pipeline_mode = #tpu.pipeline_mode<synchronous>, transform_indices = @transform_2, window_bounds = array<i64: 16, 32>}, {pipeline_mode = #tpu.pipeline_mode<synchronous>, transform_indices = @transform_3, window_bounds = array<i64: 1, 32>}, {pipeline_mode = #tpu.pipeline_mode<synchronous>, transform_indices = @transform_4, window_bounds = array<i64: 32, 32>}, {pipeline_mode = #tpu.pipeline_mode<synchronous>, transform_indices = @transform_5, window_bounds = array<i64: 1, 32>}, {pipeline_mode = #tpu.pipeline_mode<synchronous>, transform_indices = @transform_6, window_bounds = array<i64: 32, 16>}, {pipeline_mode = #tpu.pipeline_mode<synchronous>, transform_indices = @transform_7, window_bounds = array<i64: 1, 16>}, {pipeline_mode = #tpu.pipeline_mode<synchronous>, transform_indices = @transform_8, window_bounds = array<i64: 8, 32>}, {pipeline_mode = #tpu.pipeline_mode<synchronous>, transform_indices = @transform_9, window_bounds = array<i64: 1, 32>}, {pipeline_mode = #tpu.pipeline_mode<synchronous>, transform_indices = @transform_10, window_bounds = array<i64: 32, 32>}, {pipeline_mode = #tpu.pipeline_mode<synchronous>, transform_indices = @transform_11, window_bounds = array<i64: 1, 32>}, {pipeline_mode = #tpu.pipeline_mode<synchronous>, transform_indices = @transform_12, window_bounds = array<i64: 32, 16>}, {pipeline_mode = #tpu.pipeline_mode<synchronous>, transform_indices = @transform_13, window_bounds = array<i64: 1, 16>}, {transform_indices = @transform_14, window_bounds = array<i64: 32, 16>}, {transform_indices = @transform_15, window_bounds = array<i64: 32, 16>}]} {
    %c0 = arith.constant 0 : index
    %c0_0 = arith.constant 0 : index
    %0 = vector.load %arg1[%c0, %c0_0] : memref<32x16xf32, #tpu.memory_space<vmem>>, vector<32x16xf32>
    %1 = arith.truncf %0 : vector<32x16xf32> to vector<32x16xbf16>
    %c0_1 = arith.constant 0 : index
    %c0_2 = arith.constant 0 : index
    %2 = vector.load %arg3[%c0_1, %c0_2] : memref<16x32xbf16, #tpu.memory_space<vmem>>, vector<16x32xbf16>
    %cst = arith.constant dense<0.000000e+00> : vector<32x32xf32>
    %3 = tpu.matmul %1, %2, %cst {dimension_numbers = #tpu.dot_dimension_numbers<[1], [0], [0], [1], [0, 0, 1, 1], [], []>} : vector<32x16xbf16>, vector<16x32xbf16>, vector<32x32xf32> -> vector<32x32xf32>
    %c0_3 = arith.constant 0 : index
    %c0_4 = arith.constant 0 : index
    %4 = vector.load %arg4[%c0_3, %c0_4] : memref<1x32xf32, #tpu.memory_space<vmem>>, vector<1x32xf32>
    %5 = vector.broadcast %4 : vector<1x32xf32> to vector<32x32xf32>
    %6 = arith.addf %3, %5 : vector<32x32xf32>
    %cst_5 = arith.constant 0.000000e+00 : f32
    %7 = vector.broadcast %cst_5 : f32 to vector<32x32xf32>
    %8 = arith.maximumf %6, %7 : vector<32x32xf32>
    %9 = arith.truncf %8 : vector<32x32xf32> to vector<32x32xbf16>
    %c0_6 = arith.constant 0 : index
    %c0_7 = arith.constant 0 : index
    %10 = vector.load %arg5[%c0_6, %c0_7] : memref<32x32xbf16, #tpu.memory_space<vmem>>, vector<32x32xbf16>
    %cst_8 = arith.constant dense<0.000000e+00> : vector<32x32xf32>
    %11 = tpu.matmul %9, %10, %cst_8 {dimension_numbers = #tpu.dot_dimension_numbers<[1], [0], [0], [1], [0, 0, 1, 1], [], []>} : vector<32x32xbf16>, vector<32x32xbf16>, vector<32x32xf32> -> vector<32x32xf32>
    %c0_9 = arith.constant 0 : index
    %c0_10 = arith.constant 0 : index
    %12 = vector.load %arg6[%c0_9, %c0_10] : memref<1x32xf32, #tpu.memory_space<vmem>>, vector<1x32xf32>
    %13 = vector.broadcast %12 : vector<1x32xf32> to vector<32x32xf32>
    %14 = arith.addf %11, %13 : vector<32x32xf32>
    %cst_11 = arith.constant 0.000000e+00 : f32
    %15 = vector.broadcast %cst_11 : f32 to vector<32x32xf32>
    %16 = arith.maximumf %14, %15 : vector<32x32xf32>
    %17 = arith.truncf %16 : vector<32x32xf32> to vector<32x32xbf16>
    %c0_12 = arith.constant 0 : index
    %c0_13 = arith.constant 0 : index
    %18 = vector.load %arg7[%c0_12, %c0_13] : memref<32x16xbf16, #tpu.memory_space<vmem>>, vector<32x16xbf16>
    %cst_14 = arith.constant dense<0.000000e+00> : vector<32x16xf32>
    %19 = tpu.matmul %17, %18, %cst_14 {dimension_numbers = #tpu.dot_dimension_numbers<[1], [0], [0], [1], [0, 0, 1, 1], [], []>} : vector<32x32xbf16>, vector<32x16xbf16>, vector<32x16xf32> -> vector<32x16xf32>
    %c0_15 = arith.constant 0 : index
    %c0_16 = arith.constant 0 : index
    %20 = vector.load %arg8[%c0_15, %c0_16] : memref<1x16xf32, #tpu.memory_space<vmem>>, vector<1x16xf32>
    %21 = vector.broadcast %20 : vector<1x16xf32> to vector<32x16xf32>
    %22 = arith.addf %19, %21 : vector<32x16xf32>
    %23 = vector.extract_strided_slice %22 {offsets = [0, 0], sizes = [32, 8], strides = [1, 1]} : vector<32x16xf32> to vector<32x8xf32>
    %24 = vector.extract_strided_slice %22 {offsets = [0, 8], sizes = [32, 8], strides = [1, 1]} : vector<32x16xf32> to vector<32x8xf32>
    %c0_17 = arith.constant 0 : index
    %c0_18 = arith.constant 0 : index
    %25 = vector.load %arg2[%c0_17, %c0_18] : memref<32x8xf32, #tpu.memory_space<vmem>>, vector<32x8xf32>
    %cst_19 = arith.constant 5.000000e-01 : f32
    %26 = vector.broadcast %cst_19 : f32 to vector<32x8xf32>
    %27 = arith.mulf %26, %24 : vector<32x8xf32>
    %28 = math.exp %27 : vector<32x8xf32>
    %29 = arith.mulf %25, %28 : vector<32x8xf32>
    %30 = arith.addf %23, %29 : vector<32x8xf32>
    %31 = arith.truncf %30 : vector<32x8xf32> to vector<32x8xbf16>
    %c0_20 = arith.constant 0 : index
    %c0_21 = arith.constant 0 : index
    %32 = vector.load %arg9[%c0_20, %c0_21] : memref<8x32xbf16, #tpu.memory_space<vmem>>, vector<8x32xbf16>
    %cst_22 = arith.constant dense<0.000000e+00> : vector<32x32xf32>
    %33 = tpu.matmul %31, %32, %cst_22 {dimension_numbers = #tpu.dot_dimension_numbers<[1], [0], [0], [1], [0, 0, 1, 1], [], []>} : vector<32x8xbf16>, vector<8x32xbf16>, vector<32x32xf32> -> vector<32x32xf32>
    %c0_23 = arith.constant 0 : index
    %c0_24 = arith.constant 0 : index
    %34 = vector.load %arg10[%c0_23, %c0_24] : memref<1x32xf32, #tpu.memory_space<vmem>>, vector<1x32xf32>
    %35 = vector.broadcast %34 : vector<1x32xf32> to vector<32x32xf32>
    %36 = arith.addf %33, %35 : vector<32x32xf32>
    %cst_25 = arith.constant 0.000000e+00 : f32
    %37 = vector.broadcast %cst_25 : f32 to vector<32x32xf32>
    %38 = arith.maximumf %36, %37 : vector<32x32xf32>
    %39 = arith.truncf %38 : vector<32x32xf32> to vector<32x32xbf16>
    %c0_26 = arith.constant 0 : index
    %c0_27 = arith.constant 0 : index
    %40 = vector.load %arg11[%c0_26, %c0_27] : memref<32x32xbf16, #tpu.memory_space<vmem>>, vector<32x32xbf16>
    %cst_28 = arith.constant dense<0.000000e+00> : vector<32x32xf32>
    %41 = tpu.matmul %39, %40, %cst_28 {dimension_numbers = #tpu.dot_dimension_numbers<[1], [0], [0], [1], [0, 0, 1, 1], [], []>} : vector<32x32xbf16>, vector<32x32xbf16>, vector<32x32xf32> -> vector<32x32xf32>
    %c0_29 = arith.constant 0 : index
    %c0_30 = arith.constant 0 : index
    %42 = vector.load %arg12[%c0_29, %c0_30] : memref<1x32xf32, #tpu.memory_space<vmem>>, vector<1x32xf32>
    %43 = vector.broadcast %42 : vector<1x32xf32> to vector<32x32xf32>
    %44 = arith.addf %41, %43 : vector<32x32xf32>
    %cst_31 = arith.constant 0.000000e+00 : f32
    %45 = vector.broadcast %cst_31 : f32 to vector<32x32xf32>
    %46 = arith.maximumf %44, %45 : vector<32x32xf32>
    %47 = arith.truncf %46 : vector<32x32xf32> to vector<32x32xbf16>
    %c0_32 = arith.constant 0 : index
    %c0_33 = arith.constant 0 : index
    %48 = vector.load %arg13[%c0_32, %c0_33] : memref<32x16xbf16, #tpu.memory_space<vmem>>, vector<32x16xbf16>
    %cst_34 = arith.constant dense<0.000000e+00> : vector<32x16xf32>
    %49 = tpu.matmul %47, %48, %cst_34 {dimension_numbers = #tpu.dot_dimension_numbers<[1], [0], [0], [1], [0, 0, 1, 1], [], []>} : vector<32x32xbf16>, vector<32x16xbf16>, vector<32x16xf32> -> vector<32x16xf32>
    %c0_35 = arith.constant 0 : index
    %c0_36 = arith.constant 0 : index
    %50 = vector.load %arg14[%c0_35, %c0_36] : memref<1x16xf32, #tpu.memory_space<vmem>>, vector<1x16xf32>
    %51 = vector.broadcast %50 : vector<1x16xf32> to vector<32x16xf32>
    %52 = arith.addf %49, %51 : vector<32x16xf32>
    %c0_37 = arith.constant 0 : index
    %c0_38 = arith.constant 0 : index
    %53 = vector.load %arg15[%c0_37, %c0_38] : memref<32x16xf32, #tpu.memory_space<vmem>>, vector<32x16xf32>
    tpu.vector_store %arg15[%c0_37, %c0_38], %52 {strides = array<i32>} : memref<32x16xf32, #tpu.memory_space<vmem>>, vector<32x16xf32>,
    %c0_39 = arith.constant 0 : index
    %c0_40 = arith.constant 0 : index
    %54 = vector.load %arg16[%c0_39, %c0_40] : memref<32x16xf32, #tpu.memory_space<vmem>>, vector<32x16xf32>
    tpu.vector_store %arg16[%c0_39, %c0_40], %22 {strides = array<i32>} : memref<32x16xf32, #tpu.memory_space<vmem>>, vector<32x16xf32>,
    return
  }
  func.func @transform_0(%arg0: i32) -> (i32, i32) {
    %c0_i32 = arith.constant 0 : i32
    %c0_i32_0 = arith.constant 0 : i32
    return %arg0, %c0_i32 : i32, i32
  }
  func.func @transform_1(%arg0: i32) -> (i32, i32) {
    %c0_i32 = arith.constant 0 : i32
    %c0_i32_0 = arith.constant 0 : i32
    return %arg0, %c0_i32 : i32, i32
  }
  func.func @transform_2(%arg0: i32) -> (i32, i32) {
    %c0_i32 = arith.constant 0 : i32
    %c0_i32_0 = arith.constant 0 : i32
    %c0_i32_1 = arith.constant 0 : i32
    return %c0_i32, %c0_i32_0 : i32, i32
  }
  func.func @transform_3(%arg0: i32) -> (i32, i32) {
    %c0_i32 = arith.constant 0 : i32
    %c0_i32_0 = arith.constant 0 : i32
    %c0_i32_1 = arith.constant 0 : i32
    return %c0_i32, %c0_i32_0 : i32, i32
  }
  func.func @transform_4(%arg0: i32) -> (i32, i32) {
    %c0_i32 = arith.constant 0 : i32
    %c0_i32_0 = arith.constant 0 : i32
    %c0_i32_1 = arith.constant 0 : i32
    return %c0_i32, %c0_i32_0 : i32, i32
  }
  func.func @transform_5(%arg0: i32) -> (i32, i32) {
    %c0_i32 = arith.constant 0 : i32
    %c0_i32_0 = arith.constant 0 : i32
    %c0_i32_1 = arith.constant 0 : i32
    return %c0_i32, %c0_i32_0 : i32, i32
  }
  func.func @transform_6(%arg0: i32) -> (i32, i32) {
    %c0_i32 = arith.constant 0 : i32
    %c0_i32_0 = arith.constant 0 : i32
    %c0_i32_1 = arith.constant 0 : i32
    return %c0_i32, %c0_i32_0 : i32, i32
  }
  func.func @transform_7(%arg0: i32) -> (i32, i32) {
    %c0_i32 = arith.constant 0 : i32
    %c0_i32_0 = arith.constant 0 : i32
    %c0_i32_1 = arith.constant 0 : i32
    return %c0_i32, %c0_i32_0 : i32, i32
  }
  func.func @transform_8(%arg0: i32) -> (i32, i32) {
    %c0_i32 = arith.constant 0 : i32
    %c0_i32_0 = arith.constant 0 : i32
    %c0_i32_1 = arith.constant 0 : i32
    return %c0_i32, %c0_i32_0 : i32, i32
  }
  func.func @transform_9(%arg0: i32) -> (i32, i32) {
    %c0_i32 = arith.constant 0 : i32
    %c0_i32_0 = arith.constant 0 : i32
    %c0_i32_1 = arith.constant 0 : i32
    return %c0_i32, %c0_i32_0 : i32, i32
  }
  func.func @transform_10(%arg0: i32) -> (i32, i32) {
    %c0_i32 = arith.constant 0 : i32
    %c0_i32_0 = arith.constant 0 : i32
    %c0_i32_1 = arith.constant 0 : i32
    return %c0_i32, %c0_i32_0 : i32, i32
  }
  func.func @transform_11(%arg0: i32) -> (i32, i32) {
    %c0_i32 = arith.constant 0 : i32
    %c0_i32_0 = arith.constant 0 : i32
    %c0_i32_1 = arith.constant 0 : i32
    return %c0_i32, %c0_i32_0 : i32, i32
  }
  func.func @transform_12(%arg0: i32) -> (i32, i32) {
    %c0_i32 = arith.constant 0 : i32
    %c0_i32_0 = arith.constant 0 : i32
    %c0_i32_1 = arith.constant 0 : i32
    return %c0_i32, %c0_i32_0 : i32, i32
  }
  func.func @transform_13(%arg0: i32) -> (i32, i32) {
    %c0_i32 = arith.constant 0 : i32
    %c0_i32_0 = arith.constant 0 : i32
    %c0_i32_1 = arith.constant 0 : i32
    return %c0_i32, %c0_i32_0 : i32, i32
  }
  func.func @transform_14(%arg0: i32) -> (i32, i32) {
    %c0_i32 = arith.constant 0 : i32
    %c0_i32_0 = arith.constant 0 : i32
    return %arg0, %c0_i32 : i32, i32
  }
  func.func @transform_15(%arg0: i32) -> (i32, i32) {
    %c0_i32 = arith.constant 0 : i32
    %c0_i32_0 = arith.constant 0 : i32
    return %arg0, %c0_i32 : i32, i32
  }
}

</mosaic_0001>

<bundles_post_ra>
// kernel: tpu_custom_call.1
= control target key start
LH: loop header
LB: loop body
LE: loop exit
PB: predicated region body
PF: predicated region fallthrough
CT: control target
= control target key end

     0   :  { %vm71_vm0 = vcmask 130048   ;;  %vm156_vm1 = vcmask 261120   ;;  %vm353_vm2 = vcmask 1043456   ;;  %s702_s29 = smov 120   ;;  %vm346_vm3 = vcmask 64512   ;;  %s897_s2 = inlined_call_operand.vmem [shape: bf16[16,32], index: 2, kind: input, shape index: {}]   ;;  %s898_s0 = inlined_call_operand.vmem [shape: f32[32,16], index: 0, kind: input, shape index: {}]   ;;  %s899_s4 = inlined_call_operand.vmem [shape: bf16[32,32], index: 4, kind: input, shape index: {}]   ;;  %s900_s3 = inlined_call_operand.vmem [shape: f32[1,32], index: 3, kind: input, shape index: {}]   ;;  %s901_s6 = inlined_call_operand.vmem [shape: bf16[32,16], index: 6, kind: input, shape index: {}]   ;;  %s902_s5 = inlined_call_operand.vmem [shape: f32[1,32], index: 5, kind: input, shape index: {}]   ;;  %s903_s7 = inlined_call_operand.vmem [shape: f32[1,16], index: 7, kind: input, shape index: {}]   ;;  %s904_s15 = inlined_call_operand.vmem [shape: f32[32,16], index: 15, kind: output, shape index: {1}]   ;;  %s905_s8 = inlined_call_operand.vmem [shape: bf16[8,32], index: 8, kind: input, shape index: {}]   ;;  %s906_s1 = inlined_call_operand.vmem [shape: f32[32,8], index: 1, kind: input, shape index: {}]   ;;  %s907_s10 = inlined_call_operand.vmem [shape: bf16[32,32], index: 10, kind: input, shape index: {}]   ;;  %s908_s9 = inlined_call_operand.vmem [shape: f32[1,32], index: 9, kind: input, shape index: {}]   ;;  %s909_s12 = inlined_call_operand.vmem [shape: bf16[32,16], index: 12, kind: input, shape index: {}]   ;;  %s910_s11 = inlined_call_operand.vmem [shape: f32[1,32], index: 11, kind: input, shape index: {}]   ;;  %s911_s13 = inlined_call_operand.vmem [shape: f32[1,16], index: 13, kind: input, shape index: {}]   ;;  %s912_s14 = inlined_call_operand.vmem [shape: f32[32,16], index: 14, kind: output, shape index: {0}]  }
   0x1   :  { %v685_v0 = vld [vmem:[%s897_s2] sm:$0xff]   ;;  %v51_v2 = vld [vmem:[%s898_s0 + $0x8] sm:$0xff]  ;;  %v52_v3 = vld [vmem:[%s898_s0 + $0x10] sm:$0xff] }
   0x2   :  { %v50_v1 = vld [vmem:[%s898_s0] sm:$0xff]  ;;  %639 = vmatprep.subr.bf16.mxu0 %v685_v0  ;;  %v53_v5 = vld [vmem:[%s898_s0 + $0x18] sm:$0xff]  ;;  %v687_v8 = vld [vmem:[%s899_s4 + $0x8] sm:$0xff]  }
   0x3   :  { %v54_v4 = vpack.c.bf16 %v51_v2, %v50_v1  ;;  %640 = vmatpush3.bf16.msra.mxu0 %v685_v0  ;;  %v55_v6 = vpack.c.bf16 %v53_v5, %v52_v3  ;;  %v686_v7 = vld [vmem:[%s899_s4] sm:$0xff]   ;;  %v689_v25 = vld [vmem:[%s901_s6 + $0x8] sm:$0xff]   ;;  %v298_v3 = vld [vmem:[%s906_s1 + $0x10] sm:$0xff] }
   0x4   :  { %645 = vmatprep.subr.bf16.mxu1 %v686_v7  ;;  %v590_v9 = vld [vmem:[%s900_s3] ss:$0 sm:$0xff]  ;;  %v297_v5 = vld [vmem:[%s906_s1 + $0x8] sm:$0xff] }
   0x5   :  { %641 = vmatprep.mubr.msk.bf16.mxu0 %vm71_vm0, %v54_v4  ;;  %646 = vmatpush3.bf16.msra.mxu1 %v686_v7  ;;  %v688_v24 = vld [vmem:[%s901_s6] sm:$0xff]   ;;  %v299_v4 = vld [vmem:[%s906_s1 + $0x18] sm:$0xff] }
   0x6   :  { %642 = vmatmul.mubr.msk.bf16.vlgmr.msra.gmra.mrb[0].mxu0 %vm71_vm0, %v55_v6  ;;  %647 = vmatprep.subr.bf16.mxu1 %v687_v8  ;;  %v594_v26 = vld [vmem:[%s902_s5] ss:$0 sm:$0xff] }
   0x7   :  { %653 = vmatprep.subr.bf16.mxu0 %v688_v24  ;;  %v599_v41 = vld [vmem:[%s903_s7] ss:$0 sm:$0xff] }
   0x8   :  { %654 = vmatpush3.bf16.msra.mxu0 %v688_v24  ;;  %v338_v58 = vld [vmem:[%s905_s8] sm:$0xf] }
   0x9   :  { %648 = vmatpush3.bf16.msra.mxu1 %v687_v8  ;;  %655 = vmatprep.subr.bf16.mxu0 %v689_v25  ;;  %v355_v59 = vsel %vm353_vm2, %v338_v58, 0  ;;  %v296_v1 = vld [vmem:[%s906_s1] sm:$0xff] }
   0xa   :  { %683 = vmatprep.subr.msk.bf16.mxu1 %vm353_vm2, %v338_v58 }
   0xc   :  { %656 = vmatpush3.bf16.msra.mxu0 %v689_v25 }
  0xd9   :  { %v643_v10 = vpop.f32.mrb[0].mxu0 }
  0xda   :  { %v121_v11 = vadd.f32 %v643_v10, %v590_v9  ;;  %v112_v12 = vpop.f32.mrb[1].mxu0 }
  0xdb   :  { %v113_v13 = vadd.f32 %v590_v9, %v112_v12  ;;  %v644_v14 = vpop.f32.mrb[2].mxu0 }
  0xdc   :  { %v124_v15 = vadd.f32 %v644_v14, %v590_v9  ;;  %v115_v16 = vpop.f32.mrb[3].mxu0  ;;  %v129_v18 = vmax.f32 %v121_v11, 0.0 }
  0xdd   :  { %v116_v17 = vadd.f32 %v590_v9, %v115_v16  ;;  %v127_v20 = vmax.f32 %v113_v13, 0.0 }
  0xde   :  { %v130_v19 = vmax.f32 %v124_v15, 0.0 }
  0xdf   :  { %v128_v21 = vmax.f32 %v116_v17, 0.0 }
  0xe0   :  { %v132_v22 = vpack.c.bf16 %v130_v19, %v129_v18  ;;  %v690_v18 = vld [vmem:[%s907_s10] sm:$0xff]   ;;  %v691_v19 = vld [vmem:[%s907_s10 + $0x8] sm:$0xff]  }
  0xe1   :  { %v131_v23 = vpack.c.bf16 %v128_v21, %v127_v20  ;;  %667 = vmatprep.subr.bf16.mxu0 %v690_v18  ;;  %v604_v20 = vld [vmem:[%s908_s9] ss:$0 sm:$0xff] }
  0xe3   :  { %649 = vmatprep.mubr.msk.bf16.mxu1 %vm156_vm1, %v131_v23 }
  0xe4   :  { %650 = vmatmul.mubr.msk.bf16.vlgmr.msra.gmra.mrb[0].mxu1 %vm156_vm1, %v132_v22 }
  0xe5   :  { %662 = vmatpush3.bf16.msra.mxu1 %v355_v59 }
 0x1b7   :  { %v651_v27 = vpop.f32.mrb[0].mxu1 }
 0x1b8   :  { %v206_v28 = vadd.f32 %v651_v27, %v594_v26  ;;  %v197_v29 = vpop.f32.mrb[1].mxu1 }
 0x1b9   :  { %v198_v30 = vadd.f32 %v594_v26, %v197_v29  ;;  %v652_v31 = vpop.f32.mrb[2].mxu1 }
 0x1ba   :  { %v209_v32 = vadd.f32 %v652_v31, %v594_v26  ;;  %v200_v33 = vpop.f32.mrb[3].mxu1  ;;  %v214_v35 = vmax.f32 %v206_v28, 0.0 }
 0x1bb   :  { %v201_v34 = vadd.f32 %v594_v26, %v200_v33  ;;  %v212_v37 = vmax.f32 %v198_v30, 0.0 }
 0x1bc   :  { %v215_v36 = vmax.f32 %v209_v32, 0.0 }
 0x1bd   :  { %v213_v38 = vmax.f32 %v201_v34, 0.0 }
 0x1be   :  { %v217_v39 = vpack.c.bf16 %v215_v36, %v214_v35  ;;  %v692_v35 = vld [vmem:[%s909_s12] sm:$0xff]   ;;  %v693_v36 = vld [vmem:[%s909_s12 + $0x8] sm:$0xff]  }
 0x1bf   :  { %v216_v40 = vpack.c.bf16 %v213_v38, %v212_v37  ;;  %675 = vmatprep.subr.bf16.mxu1 %v692_v35  ;;  %v607_v37 = vld [vmem:[%s910_s11] ss:$0 sm:$0xff] }
 0x1c1   :  { %657 = vmatprep.mubr.msk.bf16.mxu0 %vm156_vm1, %v216_v40 }
 0x1c2   :  { %658 = vmatmul.mubr.msk.bf16.vlgmr.msra.gmra.mrb[4].mxu0 %vm156_vm1, %v217_v39 }
 0x1c3   :  { %668 = vmatpush3.bf16.msra.mxu0 %v690_v18 }
 0x1c4   :  { %669 = vmatprep.subr.bf16.mxu0 %v691_v19 }
 0x1c7   :  { %670 = vmatpush3.bf16.msra.mxu0 %v691_v19 }
 0x295   :  { %v659_v42 = vpop.f32.mrb[4].mxu0 }
 0x296   :  { %v290_v43 = vadd.f32 %v659_v42, %v599_v41  ;;  %v281_v44 = vpop.f32.mrb[5].mxu0 }
 0x297   :  { %v282_v45 = vadd.f32 %v599_v41, %v281_v44  ;;  %v660_v46 = vpop.f32.mrb[6].mxu0 }
 0x298   :  { %v302_v47 = vmul.f32 0.5, %v290_v43  ;;  %580 = vst.msk [vmem:[%s904_s15 + $0x10] sm:$0xff] %vm71_vm0, %v290_v43  ;;  %v293_v48 = vadd.f32 %v660_v46, %v599_v41  ;;  %v284_v49 = vpop.f32.mrb[7].mxu0 }
 0x299   :  { %v300_v50 = vmul.f32 0.5, %v282_v45  ;;  %578 = vst.msk [vmem:[%s904_s15] sm:$0xff] %vm71_vm0, %v282_v45  ;;  %v285_v51 = vadd.f32 %v599_v41, %v284_v49 }
 0x29a   :  { %v308_v52 = vmul.f32 1.442695, %v302_v47  ;;  %v303_v53 = vmul.f32 0.5, %v293_v48  ;;  %581 = vst.msk [vmem:[%s904_s15 + $0x18] sm:$0xff] %vm71_vm0, %v293_v48 }
 0x29b   :  { %v304_v54 = vmul.f32 1.442695, %v300_v50  ;;  %v301_v55 = vmul.f32 0.5, %v285_v51  ;;  %579 = vst.msk [vmem:[%s904_s15 + $0x8] sm:$0xff] %vm71_vm0, %v285_v51 }
 0x29c   :  { %694 = vpow2.f32 %v308_v52  ;;  %v310_v56 = vmul.f32 1.442695, %v303_v53  ;;  %v612_v52 = vld [vmem:[%s911_s13] ss:$0 sm:$0xff] }
 0x29d   :  { %696 = vpow2.f32 %v304_v54  ;;  %v306_v57 = vmul.f32 1.442695, %v301_v55 }
 0x29e   :  { %698 = vpow2.f32 %v310_v56 }
 0x29f   :  { %700 = vpow2.f32 %v306_v57 }
 0x2a6   :  { %v695_v60 = vpop.eup %694 }
 0x2a7   :  { %v697_v61 = vpop.eup %696  ;;  %320 = vrot.lane.b32.xlu1 %v695_v60, %s702_s29 }
 0x2a8   :  { %316 = vrot.lane.b32.xlu0 %v697_v61, %s702_s29  ;;  %v699_v62 = vpop.eup %698 }
 0x2a9   :  { %v701_v63 = vpop.eup %700 }
 0x2ab   :  { %322 = vrot.lane.b32.xlu1 %v699_v62, %s702_s29 }
 0x2ac   :  { %318 = vrot.lane.b32.xlu0 %v701_v63, %s702_s29 }
 0x319   :  { %v321_v0 = vpop.permute.xlu1 %320 }
 0x31a   :  { %v317_v2 = vpop.permute.xlu0 %316  ;;  %v330_v8 = vmul.f32 %v321_v0, %v298_v3 }
 0x31b   :  { %v328_v6 = vmul.f32 %v317_v2, %v296_v1 }
 0x31c   :  { %v334_v15 = vadd.f32 %v330_v8, %v290_v43 }
 0x31d   :  { %v323_v7 = vpop.permute.xlu1 %322  ;;  %v332_v13 = vadd.f32 %v328_v6, %v282_v45 }
 0x31e   :  { %v331_v9 = vmul.f32 %v323_v7, %v299_v4  ;;  %v319_v10 = vpop.permute.xlu0 %318 }
 0x31f   :  { %v329_v11 = vmul.f32 %v319_v10, %v297_v5 }
 0x320   :  { %v335_v12 = vadd.f32 %v331_v9, %v293_v48 }
 0x321   :  { %v333_v14 = vadd.f32 %v329_v11, %v285_v51 }
 0x322   :  { %v337_v17 = vpack.c.bf16 %v335_v12, %v334_v15 }
 0x323   :  { %v336_v16 = vpack.c.bf16 %v333_v14, %v332_v13 }
 0x325   :  { %663 = vmatprep.mubr.msk.bf16.mxu1 %vm346_vm3, %v336_v16 }
 0x326   :  { %664 = vmatmul.mubr.msk.bf16.vlgmr.msra.gmra.mrb[4].mxu1 %vm346_vm3, %v337_v17 }
 0x327   :  { %676 = vmatpush3.bf16.msra.mxu1 %v692_v35 }
 0x328   :  { %677 = vmatprep.subr.bf16.mxu1 %v693_v36 }
 0x32b   :  { %678 = vmatpush3.bf16.msra.mxu1 %v693_v36 }
 0x3f9   :  { %v665_v21 = vpop.f32.mrb[4].mxu1 }
 0x3fa   :  { %v400_v22 = vadd.f32 %v665_v21, %v604_v20  ;;  %v391_v23 = vpop.f32.mrb[5].mxu1 }
 0x3fb   :  { %v392_v24 = vadd.f32 %v604_v20, %v391_v23  ;;  %v666_v25 = vpop.f32.mrb[6].mxu1 }
 0x3fc   :  { %v403_v26 = vadd.f32 %v666_v25, %v604_v20  ;;  %v394_v27 = vpop.f32.mrb[7].mxu1  ;;  %v408_v29 = vmax.f32 %v400_v22, 0.0 }
 0x3fd   :  { %v395_v28 = vadd.f32 %v604_v20, %v394_v27  ;;  %v406_v31 = vmax.f32 %v392_v24, 0.0 }
 0x3fe   :  { %v409_v30 = vmax.f32 %v403_v26, 0.0 }
 0x3ff   :  { %v407_v32 = vmax.f32 %v395_v28, 0.0 }
 0x400   :  { %v411_v33 = vpack.c.bf16 %v409_v30, %v408_v29 }
 0x401   :  { %v410_v34 = vpack.c.bf16 %v407_v32, %v406_v31 }
 0x403   :  { %671 = vmatprep.mubr.msk.bf16.mxu0 %vm156_vm1, %v410_v34 }
 0x404   :  { %672 = vmatmul.mubr.msk.bf16.vlgmr.msra.gmra.mrb[8].mxu0 %vm156_vm1, %v411_v33 }
 0x4d7   :  { %v673_v38 = vpop.f32.mrb[8].mxu0 }
 0x4d8   :  { %v484_v39 = vadd.f32 %v673_v38, %v607_v37  ;;  %v475_v40 = vpop.f32.mrb[9].mxu0 }
 0x4d9   :  { %v476_v41 = vadd.f32 %v607_v37, %v475_v40  ;;  %v674_v42 = vpop.f32.mrb[10].mxu0 }
 0x4da   :  { %v487_v43 = vadd.f32 %v674_v42, %v607_v37  ;;  %v478_v44 = vpop.f32.mrb[11].mxu0  ;;  %v492_v46 = vmax.f32 %v484_v39, 0.0 }
 0x4db   :  { %v479_v45 = vadd.f32 %v607_v37, %v478_v44  ;;  %v490_v48 = vmax.f32 %v476_v41, 0.0 }
 0x4dc   :  { %v493_v47 = vmax.f32 %v487_v43, 0.0 }
 0x4dd   :  { %v491_v49 = vmax.f32 %v479_v45, 0.0 }
 0x4de   :  { %v495_v50 = vpack.c.bf16 %v493_v47, %v492_v46 }
 0x4df   :  { %v494_v51 = vpack.c.bf16 %v491_v49, %v490_v48 }
 0x4e1   :  { %679 = vmatprep.mubr.msk.bf16.mxu1 %vm156_vm1, %v494_v51 }
 0x4e2   :  { %680 = vmatmul.mubr.msk.bf16.vlgmr.msra.gmra.mrb[8].mxu1 %vm156_vm1, %v495_v50 }
 0x5b5   :  { %v681_v53 = vpop.f32.mrb[8].mxu1 }
 0x5b6   :  { %v568_v54 = vadd.f32 %v681_v53, %v612_v52  ;;  %v559_v55 = vpop.f32.mrb[9].mxu1 }
 0x5b7   :  { %v560_v56 = vadd.f32 %v612_v52, %v559_v55  ;;  %v682_v57 = vpop.f32.mrb[10].mxu1 }
 0x5b8   :  { %576 = vst.msk [vmem:[%s912_s14 + $0x10] sm:$0xff] %vm71_vm0, %v568_v54  ;;  %v571_v58 = vadd.f32 %v682_v57, %v612_v52  ;;  %v562_v59 = vpop.f32.mrb[11].mxu1 }
 0x5b9   :  { %574 = vst.msk [vmem:[%s912_s14] sm:$0xff] %vm71_vm0, %v560_v56  ;;  %v563_v60 = vadd.f32 %v612_v52, %v562_v59 }
 0x5ba   :  { %577 = vst.msk [vmem:[%s912_s14 + $0x18] sm:$0xff] %vm71_vm0, %v571_v58 }
 0x5bb   :  { %575 = vst.msk [vmem:[%s912_s14 + $0x8] sm:$0xff] %vm71_vm0, %v563_v60 }

</bundles_post_ra>
